<compile_context>
chip_gen: v6e
topology: v6e:2x2x1
jax: 0.10.0
libtpu: 0.0.40
codegen_flags: <defaults>
</compile_context>

<pallas_src>
import math

import jax
import jax.numpy as jnp
from jax.experimental import pallas as pl
from jax.experimental.pallas import tpu as pltpu


# ----------------------------------------------------------------------------
# Pallas kernel
# ----------------------------------------------------------------------------
def _to_rgb_kernel(wm_ref, x_ref, o_ref):
    """One (batch, spatial-tile) grid point of the fused ToRGB 1x1 conv.

    wm_ref : (O, C)   per-sample modulated conv weight (style folded in)
    x_ref  : (C, TL)  activation tile (NCHW with H*W flattened on the lane axis)
    o_ref  : (O, TL)  lane-dense output tile
    """
    o_ref[...] = jnp.dot(
        wm_ref[...], x_ref[...], preferred_element_type=jnp.float32
    ).astype(o_ref.dtype)


# ----------------------------------------------------------------------------
# Wrapper
# ----------------------------------------------------------------------------
def _vmem_budget_bytes():
    """~3/4 of physical VMEM, capped at 96 MiB (v7x: ~48 MiB, v5e/v6e: 96 MiB)."""
    phys = 64 * 1024 * 1024
    try:
        info = pltpu.get_tpu_info()
        phys = int(getattr(info, "vmem_capacity_bytes", phys))
    except Exception:
        pass
    return min(phys * 3 // 4, 96 * 1024 * 1024)


def _choose_tile_l(L, C, itemsize, target_bytes):
    """Spatial tile: a multiple of 128 sized for ~target_bytes of x per step.

    Returns (TL, L_pad) with TL | L_pad and L_pad >= L, so the grid has no
    ragged tail and no full-extent mega-block can blow VMEM.
    """
    L_pad = -(-L // 128) * 128                       # pad L up to multiple of 128
    tl = (target_bytes // max(1, C * itemsize)) // 128 * 128
    tl = max(128, min(tl, L_pad))                    # floor at one (8,128) tile
    L_pad = -(-L_pad // tl) * tl                     # make TL divide L_pad
    return tl, L_pad


def to_rgb(x, w_latent, params, *, target_tile_bytes=None, out_dtype=jnp.float32):
    """x: (B, C, H, W) activations (bf16 preferred), w_latent: (B, S) f32.

    Returns (B, O, H, W) in `out_dtype` (f32 by default, matching PyTorch).
    """
    B, C, H, W = x.shape
    O = params["conv_wT"].shape[0]
    L = H * W
    itemsize = jnp.dtype(x.dtype).itemsize

    vmem_cap = _vmem_budget_bytes()
    if target_tile_bytes is None:
        # ~2-8 MiB of x traffic per grid step: big enough to amortize the
        # ~0.35 us per-step overhead, small enough that 2x(x)+2x(out)+params
        # stays far under the VMEM budget on every chip.
        target_tile_bytes = max(2 * 1024 * 1024, min(8 * 1024 * 1024, vmem_cap // 8))
    TL, L_pad = _choose_tile_l(L, C, itemsize, target_tile_bytes)

    # Hoisted per-sample style + modulation (O(B*O*C), a few KB -> plain jnp):
    #   s        = w @ style_w + style_b          (EqualizedLRLinear, bias ones)
    #   w_mod[b] = conv_wT * s[b]                 (k=1 modulated conv, no demod)
    s = w_latent.astype(jnp.float32) @ params["style_w"] + params["style_b"]   # (B, C)
    w_mod = (params["conv_wT"][None, :, :] * s[:, None, :]).astype(x.dtype)    # (B, O, C)

    x3 = x.reshape(B, C, L)
    if L_pad != L:
        x3 = jnp.pad(x3, ((0, 0), (0, 0), (0, L_pad - L)))

    grid = (B, L_pad // TL)

    out3 = pl.pallas_call(
        _to_rgb_kernel,
        out_shape=jax.ShapeDtypeStruct((B, O, L_pad), out_dtype),
        grid=grid,
        in_specs=[
            pl.BlockSpec((None, O, C), lambda b, l: (b, 0, 0)),    # w_mod[b]
            pl.BlockSpec((None, C, TL), lambda b, l: (b, 0, l)),   # x tile
        ],
        out_specs=pl.BlockSpec((None, O, TL), lambda b, l: (b, 0, l)),
        compiler_params=pltpu.CompilerParams(
            dimension_semantics=("parallel", "parallel"),
            vmem_limit_bytes=vmem_cap,
        ),
    )(w_mod, x3)

    if L_pad != L:
        out3 = out3[:, :, :L]
    return out3.reshape(B, O, H, W)


# ----------------------------------------------------------------------------
# Parameter construction (matches the PyTorch module's effective math)
# ----------------------------------------------------------------------------
def init_to_rgb(key, in_channels, out_channels, style_dim):
    k1, k2 = jax.random.split(key)
    # EqualizedLRLinear(style_dim, in_channels): weight ~ N(0,1) of shape
    # (out_features, in_features); runtime scale 1/sqrt(in_features); bias ones.
    Wp = jax.random.normal(k1, (in_channels, style_dim), jnp.float32)
    style_w = (Wp / math.sqrt(style_dim)).T                  # (S, C) effective
    style_b = jnp.ones((1, in_channels), jnp.float32)
    # ModulatedConv2d(k=1, demodulate=False): weight (O, C, 1, 1) ~ N(0,1),
    # equalized-LR scale 1/sqrt(C*1*1).  Kept transposed as (O, C).
    Wc = jax.random.normal(k2, (out_channels, in_channels, 1, 1), jnp.float32)
    conv_wT = Wc[:, :, 0, 0] / math.sqrt(in_channels)        # (O, C)
    return dict(style_w=style_w, style_b=style_b, conv_wT=conv_wT)


def to_rgb_ref(x, w_latent, params):
    """Pure-JAX reference of the PyTorch forward (bf16 weight quantization
    mirrored so only MXU accumulation differs from the kernel)."""
    s = w_latent.astype(jnp.float32) @ params["style_w"] + params["style_b"]   # (B, C)
    w_mod = params["conv_wT"][None, :, :] * s[:, None, :]                      # (B, O, C)
    w_mod = w_mod.astype(x.dtype).astype(jnp.float32)
    return jnp.einsum("boc,bchw->bohw", w_mod, x.astype(jnp.float32))


# ----------------------------------------------------------------------------
if __name__ == "__main__":
    # Case 1: small shapes consistent with the module (single spatial tile).
    B, C, O, S, H, W = 2, 32, 3, 32, 16, 16
    kx, kw, kp = jax.random.split(jax.random.PRNGKey(0), 3)
    # The upstream synthesis block is assumed to hand ToRGB bf16 activations;
    # emulate that producer here (the cast does NOT live in the wrapper).
    x = jax.random.normal(kx, (B, C, H, W), jnp.float32).astype(jnp.bfloat16)
    w_latent = jax.random.normal(kw, (B, S), jnp.float32)
    params = init_to_rgb(kp, C, O, S)

    out = jax.block_until_ready(to_rgb(x, w_latent, params))
    ref = to_rgb_ref(x, w_latent, params)
    assert out.shape == (B, O, H, W), out.shape
    assert bool(jnp.all(jnp.isfinite(out)))
    assert bool(jnp.allclose(out, ref, rtol=5e-2, atol=1e-1)), \
        float(jnp.max(jnp.abs(out - ref)))

    # Case 2: force a multi-tile spatial grid (small per-step byte target ->
    # 2 spatial tiles per sample; even "parallel" extents so both v7x TCs work).
    B2, C2, H2, W2 = 2, 64, 32, 32
    kx2, kw2, kp2 = jax.random.split(jax.random.PRNGKey(1), 3)
    x2 = jax.random.normal(kx2, (B2, C2, H2, W2), jnp.float32).astype(jnp.bfloat16)
    w2 = jax.random.normal(kw2, (B2, S), jnp.float32)
    params2 = init_to_rgb(kp2, C2, O, S)

    out2 = jax.block_until_ready(to_rgb(x2, w2, params2, target_tile_bytes=64 * 1024))
    ref2 = to_rgb_ref(x2, w2, params2)
    assert out2.shape == (B2, O, H2, W2), out2.shape
    assert bool(jnp.all(jnp.isfinite(out2)))
    assert bool(jnp.allclose(out2, ref2, rtol=5e-2, atol=1e-1)), \
        float(jnp.max(jnp.abs(out2 - ref2)))

    print("KERNEL_OK")
</pallas_src>

<mosaic_0001>
module attributes {stable_mosaic.version = 11 : i64} {
  func.func @_to_rgb_kernel(%arg0: i32, %arg1: i32, %arg2: memref<1x3x32xbf16, #tpu.memory_space<vmem>>, %arg3: memref<1x32x256xbf16, #tpu.memory_space<vmem>>, %arg4: memref<1x3x256xf32, #tpu.memory_space<vmem>>) attributes {dimension_semantics = [#tpu.dimension_semantics<parallel>, #tpu.dimension_semantics<parallel>], iteration_bounds = array<i64: 2, 1>, scalar_prefetch = 0 : i64, scratch_operands = 0 : i64, tpu.core_type = #tpu.core_type<tc>, window_params = [{transform_indices = @transform_0, window_bounds = array<i64: 1, 3, 32>}, {transform_indices = @transform_1, window_bounds = array<i64: 1, 32, 256>}, {transform_indices = @transform_2, window_bounds = array<i64: 1, 3, 256>}]} {
    %c0 = arith.constant 0 : index
    %c0_0 = arith.constant 0 : index
    %c0_1 = arith.constant 0 : index
    %0 = vector.load %arg2[%c0, %c0_0, %c0_1] : memref<1x3x32xbf16, #tpu.memory_space<vmem>>, vector<1x3x32xbf16>
    %1 = vector.shape_cast %0 : vector<1x3x32xbf16> to vector<3x32xbf16>
    %c0_2 = arith.constant 0 : index
    %c0_3 = arith.constant 0 : index
    %c0_4 = arith.constant 0 : index
    %2 = vector.load %arg3[%c0_2, %c0_3, %c0_4] : memref<1x32x256xbf16, #tpu.memory_space<vmem>>, vector<1x32x256xbf16>
    %3 = vector.shape_cast %2 : vector<1x32x256xbf16> to vector<32x256xbf16>
    %cst = arith.constant dense<0.000000e+00> : vector<3x256xf32>
    %4 = tpu.matmul %1, %3, %cst {dimension_numbers = #tpu.dot_dimension_numbers<[1], [0], [0], [1], [0, 0, 1, 1], [], []>} : vector<3x32xbf16>, vector<32x256xbf16>, vector<3x256xf32> -> vector<3x256xf32>
    %c0_5 = arith.constant 0 : index
    %c0_6 = arith.constant 0 : index
    %c0_7 = arith.constant 0 : index
    %5 = vector.load %arg4[%c0_5, %c0_6, %c0_7] : memref<1x3x256xf32, #tpu.memory_space<vmem>>, vector<1x3x256xf32>
    %6 = vector.shape_cast %5 : vector<1x3x256xf32> to vector<3x256xf32>
    %7 = vector.shape_cast %4 : vector<3x256xf32> to vector<1x3x256xf32>
    tpu.vector_store %arg4[%c0_5, %c0_6, %c0_7], %7 {strides = array<i32>} : memref<1x3x256xf32, #tpu.memory_space<vmem>>, vector<1x3x256xf32>,
    return
  }
  func.func @transform_0(%arg0: i32, %arg1: i32) -> (i32, i32, i32) {
    %c0_i32 = arith.constant 0 : i32
    %c0_i32_0 = arith.constant 0 : i32
    %c0_i32_1 = arith.constant 0 : i32
    return %arg0, %c0_i32, %c0_i32_0 : i32, i32, i32
  }
  func.func @transform_1(%arg0: i32, %arg1: i32) -> (i32, i32, i32) {
    %c0_i32 = arith.constant 0 : i32
    %c0_i32_0 = arith.constant 0 : i32
    return %arg0, %c0_i32, %arg1 : i32, i32, i32
  }
  func.func @transform_2(%arg0: i32, %arg1: i32) -> (i32, i32, i32) {
    %c0_i32 = arith.constant 0 : i32
    %c0_i32_0 = arith.constant 0 : i32
    return %arg0, %c0_i32, %arg1 : i32, i32, i32
  }
}

</mosaic_0001>

<bundles_post_ra>
// kernel: tpu_custom_call.1
= control target key start
LH: loop header
LB: loop body
LE: loop exit
PB: predicated region body
PF: predicated region fallthrough
CT: control target
= control target key end

     0   :  { %7 = vsyncpa [#allocation3], 0  ;;  %s675_s0 = inlined_call_operand.vmem [shape: bf16[2,3,32], index: 0, kind: input, shape index: {}]   ;;  %s676_s1 = inlined_call_operand.hbm [shape: bf16[2,32,256], index: 1, kind: input, shape index: {}]   ;;  %s677_s2 = inlined_call_operand.vmem [shape: f32[2,3,256], index: 2, kind: output, shape index: {}]  }
   0x1   :  { %9 = vsyncpa [#allocation3 + $0x1], 0  ;;  %s576_s9 = smov 0   ;;  %s578_s10 = smov 0  }
   0x2   :  { %s580_s11 = smov 0   ;;  %s582_s12 = smov 0  }
   0x3   :  { %s584_s13 = smov 0   ;;  %s586_s14 = smov 0  }
   0x4 LB: > { %s392_s15 = sadd.s32 4294967295, %s555_s14   ;;  %s27_s16 = sadd.s32 1, %s551_s13  ;;  %s555_s14 = sphi %s586_s14, %s15_s14   ;;  %s551_s13 = sphi %s584_s13, %s685_s13   ;;  %s547_s12 = sphi %s582_s12, %s684_s12   ;;  %s543_s11 = sphi %s580_s11, %s683_s11   ;;  %s539_s10 = sphi %s578_s10, %s682_s10   ;;  %s535_s9 = sphi %s576_s9, %s681_s9  }
   0x5   : > { %p29_p0 = scmp.ge.s32.totalorder %s27_s16, 2  ;;  %s62_s17 = sadd.s32 1, %s543_s11 }
   0x6   : > { %p69_p1 = scmp.ne.s32.totalorder %s543_s11, %s539_s10  ;;  %p70_p2 = scmp.eq.s32.totalorder %s555_s14, 0 }
   0x7   : > { %s687_s16 = smov (%p29_p0, %s27_s16), 0  ;;  %p75_p4 = scmp.ne.s32.totalorder %s539_s10, %s535_s9 }
   0x8   : > { %p612_p3 = por %p70_p2, %p69_p1  ;;  %s57_s19 = ssub.s32 %s551_s13, %s687_s16 }
   0x9   : > { %p76_p5 = scmp.eq.s32.totalorder %s392_s15, 0  ;;  %p60_p6 = scmp.eq.s32.totalorder %s57_s19, 0 }
   0xa   : > { %p419_p8 = scmp.lt.s32.totalorder %s555_s14, 2  ;;  %s134_s22 = sand.u32 1, %s543_s11  }
   0xb   : > { %p619_p7 = por %p76_p5, %p75_p4  ;;  %s411_s23 = sshll.u32 %s551_s13, 9 }
   0xc   : > { %s625_s21 = scalar_select %p60_p6, %s543_s11, %s62_s17  }
   0xd   : > { %s396_s24 = sshll.u32 %s134_s22, 5  ;;  %s146_s27 = scalar_lea.hbm %s676_s1, %s411_s23 }
   0xe   : > { %s138_s28 = scalar_lea.vmem [#allocation2], %s396_s24  ;;  %p634_p9 = pnand %p419_p8, %p612_p3 }
   0xf   : > { %s147_s29 = sshll.u32 %s138_s28, 4  ;;  %s135_s3 = scalar_lea.sflag [#allocation3], %s134_s22  ;;  %s148_s29 = int_to_ptr.vmem [resolvable:$true] %s147_s29 }
  0x10   : > { %p479_p10 = pneg %p634_p9  ;;  %s490_s4 = scalar_lea.vmem %s148_s29, 512 }
  0x11   : > { %p491_p11 = scmp.ne.s32.totalorder %s148_s29, %s490_s4  ;;  %s557_s5 = smov [#allocation2]  }
  0x12   : > { %s495_s6 = sshll.u32 %s557_s5, 4  ;;  %s496_s6 = int_to_ptr.vmem [resolvable:$false] %s495_s6 }
  0x13   : > { %p493_p12 = pnand %p491_p11, %p479_p10  ;;  %s497_s7 = scalar_lea.vmem %s496_s6, 1024 }
  0x14   : > { %p498_p0 = scmp.lt.s32.totalorder %s148_s29, %s496_s6  ;;  %p499_p1 = scmp.lt.s32.totalorder %s497_s7, %s490_s4 }
  0x15   : > { %p494_p13 = pneg %p493_p12 }
  0x16   : > { %p500_p2 = por %p499_p1, %p498_p0 }
  0x18   : > { %p501_p3 = pnand %p500_p2, %p494_p13 }
  0x1a   : > { %504 = shalt.err (!%p501_p3)
}
  0x1b   : > { %s558_s8 = smov 128   ;;  %s559_s9 = smov 8  }
  0x1c   : > { %418 = dma.hbm_to_vmem [thread:$0]  (!%p634_p9), %s146_s27, 512, %s148_s29, %s135_s3, %s558_s8, %s558_s8, %s559_s9  }
  0x1d   : > { %p399_p4 = scmp.ge.s32.totalorder %s555_s14, 1  ;;  %p155_p5 = scmp.lt.s32.totalorder %s555_s14, 3 }
  0x1f   : > { %p156_p6 = pnand %p399_p4, %p155_p5 }
  0x20   : > { %s161_s15 = sand.u32 (!%p156_p6), 1, %s539_s10  }
  0x21   : > { %159 = sbr.rel (%p156_p6) target bundleno = 247 (0xf7), region = 28  ;;  %s400_s17 = sshll.u32 (!%p156_p6), %s161_s15, 5 }
  0x22   : > { %s162_s18 = scalar_lea.sflag (!%p156_p6), [#allocation3], %s161_s15  ;;  %s165_s19 = scalar_lea.vmem (!%p156_p6), [#allocation2], %s400_s17 }
  0x26   : > { %530 = dma.done.wait (%p619_p7), %s162_s18, 512  }
  0x27   : > { %532 = vsyncadd (%p619_p7), %s162_s18, 4294966784  ;;  %p194_p8 = scmp.lt.s32.totalorder %s547_s12, 1  ;;  %v560_v0 = vmov 0   ;;  %v471_v1 = vld [vmem:[%s165_s19 + $0x14] ss:$8 sps:$4 sm:$0xff]   ;;  %vm235_vm0 = vcmask 261120  }
  0x28   : > { %271 = vmatprep.mubr.bf16.mxu0 %v560_v0  ;;  %v473_v2 = vld [vmem:[%s165_s19 + $0x10] ss:$8 sps:$4 sm:$0xff]   ;;  %251 = vmatprep.subr.bf16.mxu0 %v471_v1  ;;  %v474_v3 = vld [vmem:[%s165_s19 + $0x4] ss:$8 sps:$4 sm:$0xff]   ;;  %v476_v4 = vld [vmem:[%s165_s19] ss:$8 sps:$4 sm:$0xff]  }
  0x29   : > { %s689_s12 = smov (!%p194_p8, %s547_s12), 1  ;;  %252 = vmatpush1.bf16.msra.mxu0 %v473_v2 }
  0x2a   : > { %s401_s22 = sshll.u32 %s689_s12, 1  ;;  %253 = vmatprep.subr.bf16.mxu0 %v474_v3  ;;  %s412_s20 = sshll.u32 %s689_s12, 3 }
  0x2b   : > { %s197_s25 = scalar_lea.vmem %s675_s0, %s401_s22  ;;  %s207_s28 = scalar_lea.vmem %s677_s2, %s412_s20 }
  0x2c   : > { %v210_v5 = vld [vmem:[%s197_s25] sm:$0x3] }
  0x2d   : > { %254 = vmatpush1.bf16.msra.mxu0 %v476_v4 }
  0x30   : > { %408 = vmatmul.mubr.msk.bf16.vlgmr.msra.gmra.mxu0 %vm235_vm0, %v210_v5 }
  0xf0   : > { %v273_v6 = vpop.f32.mrf.mxu0 }
  0xf2   : > { %v275_v7 = vpop.f32.mrf.mxu0 }
  0xf3   : > { %v282_v8 = vcombine.low %v273_v6, %v275_v7 }
  0xf4   : > { %v277_v9 = vpop.f32.mrf.mxu0 }
  0xf5   : > { %284 = vst [vmem:[%s207_s28] sm:$0x77] %v282_v8 }
  0xf6   : > { %v278_v10 = vpop.f32.mrf.mxu0 }
  0xf7 PF: > { %s15_s14 = sadd.s32 1, %s555_s14   ;;  %s681_s9 = smov %s539_s10 }
  0xf8   : > { %p12_p7 = scmp.ge.s32.totalorder %s15_s14, 4   ;;  %s682_s10 = smov %s543_s11 }
  0xf9   : > { %s683_s11 = smov %s625_s21  ;;  %s684_s12 = smov %s551_s13 }
  0xfa   : > { %s685_s13 = smov %s687_s16  ;;  %14 = sbr.rel (!%p12_p7) target bundleno = 4 (0x4), region = 71 }
  0xff   :  { %315 = vsyncpa [#allocation3], 1 }
 0x100   :  { %317 = vsyncpa [#allocation3 + $0x1], 1 }

</bundles_post_ra>
